<compile_context>
chip_gen: v6e
topology: v6e:2x2x1
jax: 0.10.0
libtpu: 0.0.40
codegen_flags: <defaults>
</compile_context>

<pallas_src>
import functools

import jax
import jax.numpy as jnp
from jax.experimental import pallas as pl
from jax.experimental.pallas import tpu as pltpu

_LANES = 128
_SUBLANES = 8
_BLOCK_BUDGET_BYTES = 2 * 1024 * 1024  # per input block (x2 for double buffering)


def _cdiv(a, b):
    return -(-a // b)


def _pref_kernel(x_ref, o_ref, s_acc, ss_acc, *, n_elems):
    """One grid step over a (TB states, TR rows, 128 lanes) tile.

    Accumulates per-state sum / sum-of-squares as lane-wide (TB, 1, 128)
    partials across the row-tile axis; on the last row tile it does a single
    cross-lane reduce per state and writes the unbiased variances.
    """
    r = pl.program_id(1)

    @pl.when(r == 0)
    def _():
        s_acc[...] = jnp.zeros_like(s_acc)
        ss_acc[...] = jnp.zeros_like(ss_acc)

    x = x_ref[...].astype(jnp.float32)                     # (TB, TR, 128)
    s_acc[...] += jnp.sum(x, axis=1, keepdims=True)        # (TB, 1, 128)
    ss_acc[...] += jnp.sum(x * x, axis=1, keepdims=True)   # (TB, 1, 128)

    @pl.when(r == pl.num_programs(1) - 1)
    def _():
        n = jnp.float32(n_elems)
        s = jnp.sum(s_acc[...], axis=2, keepdims=True)     # (TB, 1, 1)
        ss = jnp.sum(ss_acc[...], axis=2, keepdims=True)   # (TB, 1, 1)
        # One-pass unbiased variance (torch.var default, correction=1).
        # Zero padding contributes nothing to s/ss; true n is used here.
        # NOTE: n == 1 divides by zero -> nan, matching torch.var(ddof=1).
        o_ref[...] = (ss - s * s / n) / (n - 1.0)


def structure_preference_scorer(trajectory):
    """trajectory: list of same-shaped arrays (e.g. NCHW). Returns scalar f32."""
    if not trajectory:
        return jnp.array(0.0, dtype=jnp.float32)

    # Keep the original dtype through the DMA (upcast only inside the kernel).
    stacked = jnp.stack([jnp.asarray(s) for s in trajectory], axis=0)
    t = int(stacked.shape[0])
    n = int(stacked[0].size)
    itemsize = stacked.dtype.itemsize

    # Flatten each state into a lane-dense (rows, 128) plane, rows % 8 == 0.
    rows = _cdiv(_cdiv(n, _LANES), _SUBLANES) * _SUBLANES
    state_bytes = rows * _LANES * itemsize

    if state_bytes <= _BLOCK_BUDGET_BYTES:
        # Small states: whole state per row tile, batch many states per step.
        tr = rows
        tb = min(t, max(1, _BLOCK_BUDGET_BYTES // state_bytes))
    else:
        # Large states: one state per outer step, tile the row dimension so a
        # double-buffered block stays ~2 MiB on every TPU generation.
        tb = 1
        tr_max = max(
            _SUBLANES,
            (_BLOCK_BUDGET_BYTES // (_LANES * itemsize)) // _SUBLANES * _SUBLANES,
        )
        num_row_tiles = _cdiv(rows, tr_max)
        tr = _cdiv(_cdiv(rows, num_row_tiles), _SUBLANES) * _SUBLANES

    rows_pad = _cdiv(rows, tr) * tr
    t_pad = _cdiv(t, tb) * tb

    x = stacked.reshape(t, n)
    x = jnp.pad(x, ((0, t_pad - t), (0, rows_pad * _LANES - n)))
    x = x.reshape(t_pad, rows_pad, _LANES)

    kernel = functools.partial(_pref_kernel, n_elems=n)

    variances = pl.pallas_call(
        kernel,
        out_shape=jax.ShapeDtypeStruct((t_pad, 1, 1), jnp.float32),
        grid_spec=pltpu.PrefetchScalarGridSpec(
            num_scalar_prefetch=0,
            grid=(t_pad // tb, rows_pad // tr),
            in_specs=[pl.BlockSpec((tb, tr, _LANES), lambda i, r: (i, r, 0))],
            out_specs=pl.BlockSpec((tb, 1, 1), lambda i, r: (i, 0, 0)),
            scratch_shapes=[
                pltpu.VMEM((tb, 1, _LANES), jnp.float32),
                pltpu.VMEM((tb, 1, _LANES), jnp.float32),
            ],
        ),
        compiler_params=pltpu.CompilerParams(
            # Per-state variances are independent -> trajectory-chunk axis is
            # 'parallel' (shards across TensorCores on v7x); the row-tile axis
            # carries the sum/sumsq accumulators -> 'arbitrary'.
            dimension_semantics=("parallel", "arbitrary"),
        ),
    )(x)

    # Tiny final mean over the real (unpadded) trajectory length.
    return jnp.mean(variances[:t, 0, 0])


def _ref_score(trajectory):
    if not trajectory:
        return jnp.array(0.0, dtype=jnp.float32)
    return jnp.mean(
        jnp.stack([jnp.var(jnp.asarray(s).astype(jnp.float32), ddof=1)
                   for s in trajectory])
    )


if __name__ == "__main__":
    key = jax.random.PRNGKey(0)

    # --- main test: trajectory of 3 NCHW states (2, 4, 16, 16) ---
    keys = jax.random.split(key, 3)
    trajectory = [
        jax.random.normal(k, (2, 4, 16, 16), dtype=jnp.float32) * (i + 1)
        for i, k in enumerate(keys)
    ]
    result = jax.block_until_ready(structure_preference_scorer(trajectory))
    ref = _ref_score(trajectory)
    assert jnp.allclose(result, ref, rtol=1e-5, atol=1e-5), (result, ref)

    # --- odd-sized states (exercise zero-padding path) ---
    keys2 = jax.random.split(jax.random.PRNGKey(1), 4)
    traj_odd = [jax.random.normal(k, (5, 7), dtype=jnp.float32) + 0.5 * i
                for i, k in enumerate(keys2)]
    res_odd = jax.block_until_ready(structure_preference_scorer(traj_odd))
    ref_odd = _ref_score(traj_odd)
    assert jnp.allclose(res_odd, ref_odd, rtol=1e-5, atol=1e-5), (res_odd, ref_odd)

    # --- larger states (exercise the row-tiled path, state > 2 MiB) ---
    keys3 = jax.random.split(jax.random.PRNGKey(2), 2)
    traj_big = [jax.random.normal(k, (640, 1024), dtype=jnp.float32) * (i + 1)
                for i, k in enumerate(keys3)]
    res_big = jax.block_until_ready(structure_preference_scorer(traj_big))
    ref_big = _ref_score(traj_big)
    assert jnp.allclose(res_big, ref_big, rtol=1e-4, atol=1e-5), (res_big, ref_big)

    # --- empty-trajectory path ---
    empty = structure_preference_scorer([])
    assert float(empty) == 0.0

    print("KERNEL_OK")
</pallas_src>

<mosaic_0001>
module attributes {stable_mosaic.version = 11 : i64} {
  func.func @_pref_kernel(%arg0: i32, %arg1: i32, %arg2: memref<3x16x128xf32, #tpu.memory_space<vmem>>, %arg3: memref<3x1x1xf32, #tpu.memory_space<vmem>>, %arg4: memref<3x1x128xf32, #tpu.memory_space<vmem>>, %arg5: memref<3x1x128xf32, #tpu.memory_space<vmem>>) attributes {dimension_semantics = [#tpu.dimension_semantics<parallel>, #tpu.dimension_semantics<arbitrary>], iteration_bounds = array<i64: 1, 1>, scalar_prefetch = 0 : i64, scratch_operands = 2 : i64, tpu.core_type = #tpu.core_type<tc>, window_params = [{transform_indices = @transform_0, window_bounds = array<i64: 3, 16, 128>}, {transform_indices = @transform_1, window_bounds = array<i64: 3, 1, 1>}]} {
    %c0_i32 = arith.constant 0 : i32
    %0 = arith.cmpi eq, %arg1, %c0_i32 : i32
    %1 = arith.extui %0 : i1 to i32
    %c0_i32_0 = arith.constant 0 : i32
    %2 = arith.cmpi ne, %1, %c0_i32_0 : i32
    scf.if %2 {
      %cst_18 = arith.constant 0.000000e+00 : f32
      %18 = vector.broadcast %cst_18 : f32 to vector<3x1x128xf32>
      %c0_19 = arith.constant 0 : index
      %c0_20 = arith.constant 0 : index
      %c0_21 = arith.constant 0 : index
      %19 = vector.load %arg4[%c0_19, %c0_20, %c0_21] : memref<3x1x128xf32, #tpu.memory_space<vmem>>, vector<3x1x128xf32>
      tpu.vector_store %arg4[%c0_19, %c0_20, %c0_21], %18 {strides = array<i32>} : memref<3x1x128xf32, #tpu.memory_space<vmem>>, vector<3x1x128xf32>,
      %cst_22 = arith.constant 0.000000e+00 : f32
      %20 = vector.broadcast %cst_22 : f32 to vector<3x1x128xf32>
      %c0_23 = arith.constant 0 : index
      %c0_24 = arith.constant 0 : index
      %c0_25 = arith.constant 0 : index
      %21 = vector.load %arg5[%c0_23, %c0_24, %c0_25] : memref<3x1x128xf32, #tpu.memory_space<vmem>>, vector<3x1x128xf32>
      tpu.vector_store %arg5[%c0_23, %c0_24, %c0_25], %20 {strides = array<i32>} : memref<3x1x128xf32, #tpu.memory_space<vmem>>, vector<3x1x128xf32>,
    } else {
    }
    %c0 = arith.constant 0 : index
    %c0_1 = arith.constant 0 : index
    %c0_2 = arith.constant 0 : index
    %3 = vector.load %arg2[%c0, %c0_1, %c0_2] : memref<3x16x128xf32, #tpu.memory_space<vmem>>, vector<3x16x128xf32>
    %c0_3 = arith.constant 0 : index
    %c0_4 = arith.constant 0 : index
    %c0_5 = arith.constant 0 : index
    %4 = vector.load %arg4[%c0_3, %c0_4, %c0_5] : memref<3x1x128xf32, #tpu.memory_space<vmem>>, vector<3x1x128xf32>
    %cst = arith.constant dense<0.000000e+00> : vector<3x128xf32>
    %5 = vector.multi_reduction <add>, %3, %cst [1] : vector<3x16x128xf32> to vector<3x128xf32>
    %6 = vector.shape_cast %5 : vector<3x128xf32> to vector<3x1x128xf32>
    %7 = arith.addf %4, %6 : vector<3x1x128xf32>
    %c0_6 = arith.constant 0 : index
    %c0_7 = arith.constant 0 : index
    %c0_8 = arith.constant 0 : index
    %8 = vector.load %arg4[%c0_6, %c0_7, %c0_8] : memref<3x1x128xf32, #tpu.memory_space<vmem>>, vector<3x1x128xf32>
    tpu.vector_store %arg4[%c0_6, %c0_7, %c0_8], %7 {strides = array<i32>} : memref<3x1x128xf32, #tpu.memory_space<vmem>>, vector<3x1x128xf32>,
    %c0_9 = arith.constant 0 : index
    %c0_10 = arith.constant 0 : index
    %c0_11 = arith.constant 0 : index
    %9 = vector.load %arg5[%c0_9, %c0_10, %c0_11] : memref<3x1x128xf32, #tpu.memory_space<vmem>>, vector<3x1x128xf32>
    %10 = arith.mulf %3, %3 : vector<3x16x128xf32>
    %cst_12 = arith.constant dense<0.000000e+00> : vector<3x128xf32>
    %11 = vector.multi_reduction <add>, %10, %cst_12 [1] : vector<3x16x128xf32> to vector<3x128xf32>
    %12 = vector.shape_cast %11 : vector<3x128xf32> to vector<3x1x128xf32>
    %13 = arith.addf %9, %12 : vector<3x1x128xf32>
    %c0_13 = arith.constant 0 : index
    %c0_14 = arith.constant 0 : index
    %c0_15 = arith.constant 0 : index
    %14 = vector.load %arg5[%c0_13, %c0_14, %c0_15] : memref<3x1x128xf32, #tpu.memory_space<vmem>>, vector<3x1x128xf32>
    tpu.vector_store %arg5[%c0_13, %c0_14, %c0_15], %13 {strides = array<i32>} : memref<3x1x128xf32, #tpu.memory_space<vmem>>, vector<3x1x128xf32>,
    %c0_i32_16 = arith.constant 0 : i32
    %15 = arith.cmpi eq, %arg1, %c0_i32_16 : i32
    %16 = arith.extui %15 : i1 to i32
    %c0_i32_17 = arith.constant 0 : i32
    %17 = arith.cmpi ne, %16, %c0_i32_17 : i32
    scf.if %17 {
      %c0_18 = arith.constant 0 : index
      %c0_19 = arith.constant 0 : index
      %c0_20 = arith.constant 0 : index
      %18 = vector.load %arg4[%c0_18, %c0_19, %c0_20] : memref<3x1x128xf32, #tpu.memory_space<vmem>>, vector<3x1x128xf32>
      %cst_21 = arith.constant dense<0.000000e+00> : vector<3x1xf32>
      %19 = vector.multi_reduction <add>, %18, %cst_21 [2] : vector<3x1x128xf32> to vector<3x1xf32>
      %20 = vector.shape_cast %19 : vector<3x1xf32> to vector<3x1x1xf32>
      %c0_22 = arith.constant 0 : index
      %c0_23 = arith.constant 0 : index
      %c0_24 = arith.constant 0 : index
      %21 = vector.load %arg5[%c0_22, %c0_23, %c0_24] : memref<3x1x128xf32, #tpu.memory_space<vmem>>, vector<3x1x128xf32>
      %cst_25 = arith.constant dense<0.000000e+00> : vector<3x1xf32>
      %22 = vector.multi_reduction <add>, %21, %cst_25 [2] : vector<3x1x128xf32> to vector<3x1xf32>
      %23 = vector.shape_cast %22 : vector<3x1xf32> to vector<3x1x1xf32>
      %24 = arith.mulf %20, %20 : vector<3x1x1xf32>
      %cst_26 = arith.constant 2.048000e+03 : f32
      %25 = vector.broadcast %cst_26 : f32 to vector<3x1x1xf32>
      %26 = arith.divf %24, %25 : vector<3x1x1xf32>
      %27 = arith.subf %23, %26 : vector<3x1x1xf32>
      %cst_27 = arith.constant 2.048000e+03 : f32
      %cst_28 = arith.constant 1.000000e+00 : f32
      %28 = arith.subf %cst_27, %cst_28 : f32
      %29 = vector.broadcast %28 : f32 to vector<3x1x1xf32>
      %30 = arith.divf %27, %29 : vector<3x1x1xf32>
      %c0_29 = arith.constant 0 : index
      %c0_30 = arith.constant 0 : index
      %c0_31 = arith.constant 0 : index
      %31 = vector.load %arg3[%c0_29, %c0_30, %c0_31] : memref<3x1x1xf32, #tpu.memory_space<vmem>>, vector<3x1x1xf32>
      tpu.vector_store %arg3[%c0_29, %c0_30, %c0_31], %30 {strides = array<i32>} : memref<3x1x1xf32, #tpu.memory_space<vmem>>, vector<3x1x1xf32>,
    } else {
    }
    return
  }
  func.func @transform_0(%arg0: i32, %arg1: i32) -> (i32, i32, i32) {
    %c0_i32 = arith.constant 0 : i32
    %c0_i32_0 = arith.constant 0 : i32
    return %arg0, %arg1, %c0_i32 : i32, i32, i32
  }
  func.func @transform_1(%arg0: i32, %arg1: i32) -> (i32, i32, i32) {
    %c0_i32 = arith.constant 0 : i32
    %c0_i32_0 = arith.constant 0 : i32
    %c0_i32_1 = arith.constant 0 : i32
    return %arg0, %c0_i32, %c0_i32_0 : i32, i32, i32
  }
}

</mosaic_0001>

<bundles_post_ra>
// kernel: tpu_custom_call.1
= control target key start
LH: loop header
LB: loop body
LE: loop exit
PB: predicated region body
PF: predicated region fallthrough
CT: control target
= control target key end

     0   :  { %6 = vsyncpa [#allocation5], 0  ;;  %s181_s6 = smov [#allocation4]   ;;  %s213_s0 = inlined_call_operand.hbm [shape: f32[3,16,128], index: 0, kind: input, shape index: {}]   ;;  %s214_s1 = inlined_call_operand.vmem [shape: f32[3,1,1], index: 1, kind: output, shape index: {}]  }
   0x1   :  { %s12_s7 = sshll.u32 %s181_s6, 4  ;;  %s13_s7 = int_to_ptr.vmem [resolvable:$true] %s12_s7 }
   0x2   :  { %s167_s8 = scalar_lea.vmem %s13_s7, 768  ;;  %p172_p1 = scmp.lt.s32.totalorder %s13_s7, %s13_s7 }
   0x3   :  { %p168_p0 = scmp.ne.s32.totalorder %s13_s7, %s167_s8  ;;  %p173_p2 = scmp.lt.s32.totalorder %s167_s8, %s167_s8 }
   0x5   :  { %p174_p3 = por %p173_p2, %p172_p1 }
   0x7   :  { %p175_p4 = pnand %p174_p3, %p168_p0 }
   0x9   :  { %178 = shalt.err (!%p175_p4)
}
   0xa   :  { %s182_s9 = smov 128   ;;  %s183_s10 = smov 8  }
   0xb   :  { %18 = dma.hbm_to_vmem [thread:$0]  %s213_s0, 768, %s13_s7, [#allocation5], %s182_s9, %s182_s9, %s183_s10  }
   0xc   :  { %179 = dma.done.wait [#allocation5], 768  }
   0xd   :  { %180 = vsyncadd [#allocation5], 4294966528  ;;  %v184_v0 = vmov 0.0   ;;  %v36_v1 = vld [vmem:[#allocation4 + $0x20] sm:$0xff]  ;;  %v37_v2 = vld [vmem:[#allocation4 + $0x28] sm:$0xff]  ;;  %vm110_vm0 = vcmask 1040384  }
   0xe   :  { %28 = vst [vmem:[#allocation2 + $0x2] sm:$0x1] %v184_v0  ;;  %26 = vst [vmem:[#allocation2] sm:$0x1] %v184_v0  ;;  %v32_v3 = vld [vmem:[#allocation4] sm:$0xff]  ;;  %v55_v4 = vadd.f32 %v37_v2, %v36_v1  ;;  %v75_v5 = vmul.f32 %v36_v1, %v36_v1  ;;  %v76_v6 = vmul.f32 %v37_v2, %v37_v2  ;;  %v33_v7 = vld [vmem:[#allocation4 + $0x8] sm:$0xff] }
   0xf   :  { %27 = vst [vmem:[#allocation2 + $0x1] sm:$0x1] %v184_v0  ;;  %29 = vst [vmem:[#allocation3] sm:$0x1] %v184_v0  ;;  %v71_v8 = vmul.f32 %v32_v3, %v32_v3  ;;  %v41_v9 = vadd.f32 %v33_v7, %v32_v3  ;;  %v72_v10 = vmul.f32 %v33_v7, %v33_v7  ;;  %v34_v11 = vld [vmem:[#allocation4 + $0x10] sm:$0xff]  ;;  %v35_v12 = vld [vmem:[#allocation4 + $0x18] sm:$0xff] }
  0x10   :  { %30 = vst [vmem:[#allocation3 + $0x1] sm:$0x1] %v184_v0  ;;  %31 = vst [vmem:[#allocation3 + $0x2] sm:$0x1] %v184_v0  ;;  %v56_v13 = vrot.slane %v55_v4, 4  ;;  %v48_v14 = vadd.f32 %v35_v12, %v34_v11  ;;  %v91_v15 = vadd.f32 %v76_v6, %v75_v5  ;;  %v73_v16 = vmul.f32 %v34_v11, %v34_v11 }
  0x11   :  { %v42_v17 = vrot.slane %v41_v9, 4  ;;  %v77_v18 = vadd.f32 %v72_v10, %v71_v8  ;;  %v74_v19 = vmul.f32 %v35_v12, %v35_v12  ;;  %vm146_vm1 = vcmask 0  }
  0x12   :  { %v57_v20 = vadd.f32 %v56_v13, %v55_v4  ;;  %v49_v21 = vrot.slane %v48_v14, 4  ;;  %v92_v22 = vrot.slane %v91_v15, 4 }
  0x13   :  { %v43_v23 = vadd.f32 %v42_v17, %v41_v9  ;;  %v78_v24 = vrot.slane %v77_v18, 4  ;;  %v84_v25 = vadd.f32 %v74_v19, %v73_v16 }
  0x14   :  { %v58_v26 = vrot.slane %v57_v20, 2  ;;  %v50_v27 = vadd.f32 %v49_v21, %v48_v14  ;;  %v93_v28 = vadd.f32 %v92_v22, %v91_v15 }
  0x15   :  { %v44_v29 = vrot.slane %v43_v23, 2  ;;  %v79_v30 = vadd.f32 %v78_v24, %v77_v18  ;;  %v85_v31 = vrot.slane %v84_v25, 4  ;;  %v40_v41 = vld [vmem:[#allocation2 + $0x2] sm:$0x1]  ;;  %v38_v46 = vld [vmem:[#allocation2] sm:$0x1] }
  0x16   :  { %v59_v32 = vadd.f32 %v58_v26, %v57_v20  ;;  %v51_v33 = vrot.slane %v50_v27, 2  ;;  %v94_v34 = vrot.slane %v93_v28, 2  ;;  %v39_v51 = vld [vmem:[#allocation2 + $0x1] sm:$0x1]  ;;  %v68_v55 = vld [vmem:[#allocation3] sm:$0x1] }
  0x17   :  { %v45_v35 = vadd.f32 %v44_v29, %v43_v23  ;;  %v80_v36 = vrot.slane %v79_v30, 2  ;;  %v86_v37 = vadd.f32 %v85_v31, %v84_v25  ;;  %v70_v52 = vld [vmem:[#allocation3 + $0x2] sm:$0x1]  ;;  %v69_v63 = vld [vmem:[#allocation3 + $0x1] sm:$0x1] }
  0x18   :  { %v60_v38 = vrot.slane %v59_v32, 1  ;;  %v52_v39 = vadd.f32 %v51_v33, %v50_v27  ;;  %v95_v40 = vadd.f32 %v94_v34, %v93_v28 }
  0x19   :  { %v46_v42 = vrot.slane %v45_v35, 1  ;;  %v81_v43 = vadd.f32 %v80_v36, %v79_v30  ;;  %v87_v44 = vrot.slane %v86_v37, 2 }
  0x1a   :  { %v61_v45 = vadd.f32 %v60_v38, %v59_v32  ;;  %v53_v47 = vrot.slane %v52_v39, 1  ;;  %v96_v48 = vrot.slane %v95_v40, 1 }
  0x1b   :  { %v47_v49 = vadd.f32 %v46_v42, %v45_v35  ;;  %v82_v50 = vrot.slane %v81_v43, 1  ;;  %v88_v53 = vadd.f32 %v87_v44, %v86_v37 }
  0x1c   :  { %v64_v54 = vadd.f32 %v61_v45, %v40_v41  ;;  %v54_v56 = vadd.f32 %v53_v47, %v52_v39  ;;  %v97_v57 = vadd.f32 %v96_v48, %v95_v40 }
  0x1d   :  { %v62_v58 = vadd.f32 %v47_v49, %v38_v46  ;;  %v83_v59 = vadd.f32 %v82_v50, %v81_v43  ;;  %v89_v60 = vrot.slane %v88_v53, 1 }
  0x1e   :  { %67 = vst [vmem:[#allocation2 + $0x2] sm:$0x1] %v64_v54  ;;  %v63_v61 = vadd.f32 %v54_v56, %v39_v51  ;;  %v100_v62 = vadd.f32 %v97_v57, %v70_v52 }
  0x1f   :  { %65 = vst [vmem:[#allocation2] sm:$0x1] %v62_v58  ;;  %v98_v0 = vadd.f32 %v83_v59, %v68_v55  ;;  %v90_v1 = vadd.f32 %v89_v60, %v88_v53 }
  0x20   :  { %66 = vst [vmem:[#allocation2 + $0x1] sm:$0x1] %v63_v61  ;;  %103 = vst [vmem:[#allocation3 + $0x2] sm:$0x1] %v100_v62 }
  0x21   :  { %101 = vst [vmem:[#allocation3] sm:$0x1] %v98_v0  ;;  %v99_v2 = vadd.f32 %v90_v1, %v69_v63 }
  0x23   :  { %102 = vst [vmem:[#allocation3 + $0x1] sm:$0x1] %v99_v2 }
  0x25   :  { %v109_v3 = vld [vmem:[#allocation2 + $0x2] sm:$0x1] }
  0x26   :  { %v117_v4 = vsel %vm110_vm0, %v109_v3, 0.0  ;;  %v107_v5 = vld [vmem:[#allocation2] sm:$0x1] }
  0x27   :  { %118 = vadd.xlane.f32.xlu1 %v117_v4  ;;  %v111_v6 = vsel %vm110_vm0, %v107_v5, 0.0  ;;  %v108_v7 = vld [vmem:[#allocation2 + $0x1] sm:$0x1]  ;;  %v122_v11 = vld [vmem:[#allocation3 + $0x2] sm:$0x1] }
  0x28   :  { %112 = vadd.xlane.f32.xlu0 %v111_v6  ;;  %v120_v8 = vld [vmem:[#allocation3] sm:$0x1]  ;;  %v114_v10 = vsel %vm110_vm0, %v108_v7, 0.0  ;;  %v129_v13 = vsel %vm110_vm0, %v122_v11, 0.0 }
  0x29   :  { %v123_v9 = vsel %vm110_vm0, %v120_v8, 0.0 }
  0x2a   :  { %v121_v12 = vld [vmem:[#allocation3 + $0x1] sm:$0x1] }
  0x2b   :  { %124 = vadd.xlane.f32.xlu1 %v123_v9  ;;  %v126_v14 = vsel %vm110_vm0, %v121_v12, 0.0 }
  0x2c   :  { %115 = vadd.xlane.f32.xlu0 %v114_v10 }
  0x2f   :  { %130 = vadd.xlane.f32.xlu1 %v129_v13 }
  0x30   :  { %127 = vadd.xlane.f32.xlu0 %v126_v14 }
  0xb0   :  { %v119_v15 = vpop.xlane.xlu1 %118 }
  0xb1   :  { %v113_v16 = vpop.xlane.xlu0 %112  ;;  %v134_v18 = vmul.f32 %v119_v15, %v119_v15 }
  0xb2   :  { %v132_v17 = vmul.f32 %v113_v16, %v113_v16 }
  0xb3   :  { %v138_v24 = vmul.f32 0.00048828125, %v134_v18 }
  0xb4   :  { %v136_v19 = vmul.f32 0.00048828125, %v132_v17  ;;  %v125_v20 = vpop.xlane.xlu1 %124 }
  0xb5   :  { %v116_v21 = vpop.xlane.xlu0 %115 }
  0xb6   :  { %v139_v22 = vsub.f32 %v125_v20, %v136_v19  ;;  %v133_v23 = vmul.f32 %v116_v21, %v116_v21 }
  0xb8   :  { %v143_v25 = vmul.f32 0.0004885198, %v139_v22  ;;  %v137_v26 = vmul.f32 0.00048828125, %v133_v23  ;;  %v131_v27 = vpop.xlane.xlu1 %130 }
  0xb9   :  { %v141_v28 = vsub.f32 %v131_v27, %v138_v24  ;;  %v128_v29 = vpop.xlane.xlu0 %127 }
  0xba   :  { %147 = vst.msk [vmem:[%s214_s1] sm:$0x1] %vm146_vm1, %v143_v25  ;;  %v140_v30 = vsub.f32 %v128_v29, %v137_v26 }
  0xbb   :  { %v145_v31 = vmul.f32 0.0004885198, %v141_v28 }
  0xbc   :  { %v144_v32 = vmul.f32 0.0004885198, %v140_v30 }
  0xbd   :  { %149 = vst.msk [vmem:[%s214_s1 + $0x2] sm:$0x1] %vm146_vm1, %v145_v31 }
  0xbe   :  { %148 = vst.msk [vmem:[%s214_s1 + $0x1] sm:$0x1] %vm146_vm1, %v144_v32 }
  0xbf   :  { %154 = vsyncpa [#allocation5], 1 }

</bundles_post_ra>
